<compile_context>
chip_gen: v5e
topology: v5e:2x2
jax: 0.10.0
libtpu: 0.0.40
codegen_flags: <defaults>
</compile_context>

<pallas_src>
import jax
import jax.numpy as jnp
from jax import lax
from jax.experimental import pallas as pl
from jax.experimental.pallas import tpu as pltpu


def _round_up(x, m):
    return (x + m - 1) // m * m


def _window_mlp_kernel(ids_ref, w1f_ref, b1_ref, w2_ref, b2_ref, w3_ref, b3_ref,
                       o_ref):
    ids = ids_ref[...]                         # (TB, W) int32 token ids
    tb, win = ids.shape
    kp = w1f_ref.shape[0]                      # W * Vp (stacked, 128-aligned bands)
    vp = kp // win                             # padded vocab per band
    out_size = o_ref.shape[1]                  # real number of classes (O)

    # --- Layer 1, fused with the embedding gather ---------------------------
    # Stacked one-hot (TB, W*Vp): band w holds one_hot(ids[:, w]).  Since the
    # target column w*Vp + ids[:, w] always lies inside band w, OR-ing W
    # full-width compares against one iota builds it with plain VPU ops.
    cols = lax.broadcasted_iota(jnp.int32, (tb, kp), 1)
    hit = cols == ids[:, 0:1]
    for w in range(1, win):                    # static tiny loop (window width)
        hit = hit | (cols == (ids[:, w:w + 1] + w * vp))
    onehot = hit.astype(jnp.float32)

    # one_hot_stacked @ (embed @ W1 stacked)  ==  concat_w(embed[ids[:,w]]) @ W1
    h0 = jnp.maximum(
        jnp.dot(onehot, w1f_ref[...], preferred_element_type=jnp.float32)
        + b1_ref[...], 0.0)
    # TODO(synk): dropout(0.3) applies only when is_training=True; inference path here.

    # --- Layer 2 -------------------------------------------------------------
    h1 = jnp.maximum(
        jnp.dot(h0, w2_ref[...], preferred_element_type=jnp.float32) + b2_ref[...],
        0.0)

    # --- Output layer + numerically-stable log-softmax over dim=1 ------------
    logits = jnp.dot(h1, w3_ref[...], preferred_element_type=jnp.float32) + b3_ref[...]
    lane_o = lax.broadcasted_iota(jnp.int32, logits.shape, 1)
    logits = jnp.where(lane_o < out_size, logits, -jnp.inf)   # mask padded lanes
    m = jnp.max(logits, axis=1, keepdims=True)
    shifted = logits - m
    lse = jnp.log(jnp.sum(jnp.exp(shifted), axis=1, keepdims=True))
    # Store only the real class lanes -> dense (Bp, O) HBM writeback, no dead lanes.
    o_ref[...] = (shifted - lse)[:, :out_size]


def prepare_params(params):
    """One-time (per weight update) fold of the embedding into layer 1 + padding.

    Hoisted out of the forward so the per-call work is just the pallas_call.
    """
    embed_w, w1, b1, w2, b2, w3, b3 = params
    V, E = embed_w.shape
    in_dim, H = w1.shape
    W = in_dim // E
    O = w3.shape[1]

    Vp = _round_up(V, 128)
    Hp = _round_up(H, 128)
    Op = _round_up(O, 128)
    f32 = jnp.float32
    hi = lax.Precision.HIGHEST

    # Fold embedding into layer 1, one (V, H) block per window position, then
    # stack the W blocks along the contraction axis -> single K = W*Vp matmul.
    w1_3d = w1.astype(f32).reshape(W, E, H)
    w1f = jnp.einsum("ve,weh->wvh", embed_w.astype(f32), w1_3d, precision=hi)
    w1f = jnp.pad(w1f, ((0, 0), (0, Vp - V), (0, Hp - H))).reshape(W * Vp, Hp)

    b1p = jnp.pad(b1.astype(f32), ((0, 0), (0, Hp - H)))
    w2p = jnp.pad(w2.astype(f32), ((0, Hp - H), (0, Hp - H)))
    b2p = jnp.pad(b2.astype(f32), ((0, 0), (0, Hp - H)))
    w3p = jnp.pad(w3.astype(f32), ((0, Hp - H), (0, Op - O)))
    b3p = jnp.pad(b3.astype(f32), ((0, 0), (0, Op - O)))

    return {
        "w1f": w1f, "b1": b1p, "w2": w2p, "b2": b2p, "w3": w3p, "b3": b3p,
        "window": W, "out_size": O,
    }


def window_classifier_forward(inputs, prep, *, block_b=1024):
    """inputs: (B, WINDOW) int32 token ids.  Returns (B, output_size) log-probs."""
    B, W = inputs.shape
    assert W == prep["window"], "window width mismatch vs prepared params"
    O = prep["out_size"]

    # Batch tiling: big tiles amortize the ~0.35us per-grid-step overhead; the
    # VMEM footprint stays far under the scoped limit even at TB=2048.  For
    # large batches keep >= 2 grid steps so the "parallel" axis can shard across
    # both v7x TensorCores.
    TB = min(block_b, _round_up(B, 8))
    if B >= 256 and B <= TB:
        TB = _round_up(pl.cdiv(B, 2), 8)
    Bp = _round_up(B, TB)

    ids = inputs.astype(jnp.int32)
    if Bp != B:
        # Padded rows carry token id 0 (valid vocab row) -> finite garbage, sliced off.
        ids = jnp.pad(ids, ((0, Bp - B), (0, 0)))
    grid = (Bp // TB,)

    def resident(arr):
        nd = arr.ndim
        return pl.BlockSpec(arr.shape, lambda i: (0,) * nd)

    out = pl.pallas_call(
        _window_mlp_kernel,
        out_shape=jax.ShapeDtypeStruct((Bp, O), jnp.float32),
        grid_spec=pltpu.PrefetchScalarGridSpec(
            num_scalar_prefetch=0,
            grid=grid,
            in_specs=[
                pl.BlockSpec((TB, W), lambda i: (i, 0)),   # token ids per batch tile
                resident(prep["w1f"]), resident(prep["b1"]),
                resident(prep["w2"]), resident(prep["b2"]),
                resident(prep["w3"]), resident(prep["b3"]),
            ],
            out_specs=pl.BlockSpec((TB, O), lambda i: (i, 0)),
        ),
        compiler_params=pltpu.CompilerParams(
            dimension_semantics=("parallel",),
            vmem_limit_bytes=32 * 1024 * 1024),
    )(ids, prep["w1f"], prep["b1"], prep["w2"], prep["b2"], prep["w3"], prep["b3"])

    return out if Bp == B else out[:B]


def init_params(key, vocab_size, embedding_size, window_size, hidden_size, output_size):
    W = window_size * 2 + 1
    in_dim = embedding_size * W
    ks = jax.random.split(key, 7)
    embed_w = jax.random.normal(ks[0], (vocab_size, embedding_size), jnp.float32) * 0.1
    w1 = jax.random.normal(ks[1], (in_dim, hidden_size), jnp.float32) * 0.1
    b1 = jax.random.normal(ks[2], (1, hidden_size), jnp.float32) * 0.01
    w2 = jax.random.normal(ks[3], (hidden_size, hidden_size), jnp.float32) * 0.1
    b2 = jax.random.normal(ks[4], (1, hidden_size), jnp.float32) * 0.01
    w3 = jax.random.normal(ks[5], (hidden_size, output_size), jnp.float32) * 0.1
    b3 = jax.random.normal(ks[6], (1, output_size), jnp.float32) * 0.01
    return (embed_w, w1, b1, w2, b2, w3, b3)


def reference_forward(inputs, params):
    embed_w, w1, b1, w2, b2, w3, b3 = params
    B, W = inputs.shape
    E = embed_w.shape[1]
    hi = lax.Precision.HIGHEST
    x = jnp.take(embed_w, inputs, axis=0).reshape(B, W * E)
    h0 = jnp.maximum(jnp.dot(x, w1, precision=hi) + b1, 0.0)
    h1 = jnp.maximum(jnp.dot(h0, w2, precision=hi) + b2, 0.0)
    logits = jnp.dot(h1, w3, precision=hi) + b3
    return jax.nn.log_softmax(logits, axis=1)


if __name__ == "__main__":
    vocab_size = 50
    embedding_size = 16
    window_size = 2           # -> window width = 5 tokens
    hidden_size = 32
    output_size = 8
    batch = 8

    key = jax.random.PRNGKey(0)
    pkey, ikey, ikey2 = jax.random.split(key, 3)
    params = init_params(pkey, vocab_size, embedding_size, window_size,
                         hidden_size, output_size)
    prep = prepare_params(params)            # hoisted: fold/pad once, reuse per call

    inputs = jax.random.randint(
        ikey, (batch, window_size * 2 + 1), 0, vocab_size, dtype=jnp.int32)

    out = window_classifier_forward(inputs, prep)
    out = jax.block_until_ready(out)

    ref = reference_forward(inputs, params)
    assert out.shape == (batch, output_size)
    err = jnp.max(jnp.abs(out - ref))
    assert jnp.allclose(out, ref, atol=1e-4, rtol=1e-4), f"mismatch vs reference, max abs err={err}"

    # Second check: non-multiple-of-8 batch exercises the pad/slice path.
    batch2 = 37
    inputs2 = jax.random.randint(
        ikey2, (batch2, window_size * 2 + 1), 0, vocab_size, dtype=jnp.int32)
    out2 = jax.block_until_ready(window_classifier_forward(inputs2, prep))
    ref2 = reference_forward(inputs2, params)
    assert out2.shape == (batch2, output_size)
    err2 = jnp.max(jnp.abs(out2 - ref2))
    assert jnp.allclose(out2, ref2, atol=1e-4, rtol=1e-4), f"mismatch (padded batch), max abs err={err2}"

    print("KERNEL_OK")
</pallas_src>

<mosaic_0001>
module attributes {stable_mosaic.version = 11 : i64} {
  func.func @_window_mlp_kernel(%arg0: i32, %arg1: memref<8x5xi32, #tpu.memory_space<vmem>>, %arg2: memref<640x128xf32, #tpu.memory_space<vmem>>, %arg3: memref<1x128xf32, #tpu.memory_space<vmem>>, %arg4: memref<128x128xf32, #tpu.memory_space<vmem>>, %arg5: memref<1x128xf32, #tpu.memory_space<vmem>>, %arg6: memref<128x128xf32, #tpu.memory_space<vmem>>, %arg7: memref<1x128xf32, #tpu.memory_space<vmem>>, %arg8: memref<8x8xf32, #tpu.memory_space<vmem>>) attributes {dimension_semantics = [#tpu.dimension_semantics<parallel>], iteration_bounds = array<i64: 1>, scalar_prefetch = 0 : i64, scratch_operands = 0 : i64, tpu.core_type = #tpu.core_type<tc>, window_params = [{transform_indices = @transform_0, window_bounds = array<i64: 8, 5>}, {pipeline_mode = #tpu.pipeline_mode<synchronous>, transform_indices = @transform_1, window_bounds = array<i64: 640, 128>}, {pipeline_mode = #tpu.pipeline_mode<synchronous>, transform_indices = @transform_2, window_bounds = array<i64: 1, 128>}, {pipeline_mode = #tpu.pipeline_mode<synchronous>, transform_indices = @transform_3, window_bounds = array<i64: 128, 128>}, {pipeline_mode = #tpu.pipeline_mode<synchronous>, transform_indices = @transform_4, window_bounds = array<i64: 1, 128>}, {pipeline_mode = #tpu.pipeline_mode<synchronous>, transform_indices = @transform_5, window_bounds = array<i64: 128, 128>}, {pipeline_mode = #tpu.pipeline_mode<synchronous>, transform_indices = @transform_6, window_bounds = array<i64: 1, 128>}, {transform_indices = @transform_7, window_bounds = array<i64: 8, 8>}]} {
    %c0 = arith.constant 0 : index
    %c0_0 = arith.constant 0 : index
    %0 = vector.load %arg1[%c0, %c0_0] : memref<8x5xi32, #tpu.memory_space<vmem>>, vector<8x5xi32>
    %1 = tpu.iota {dimensions = array<i32: 1>} : vector<8x640xi32>
    %2 = vector.extract_strided_slice %0 {offsets = [0, 0], sizes = [8, 1], strides = [1, 1]} : vector<8x5xi32> to vector<8x1xi32>
    %3 = vector.broadcast %2 : vector<8x1xi32> to vector<8x640xi32>
    %4 = arith.cmpi eq, %1, %3 : vector<8x640xi32>
    %5 = vector.extract_strided_slice %0 {offsets = [0, 1], sizes = [8, 1], strides = [1, 1]} : vector<8x5xi32> to vector<8x1xi32>
    %c128_i32 = arith.constant 128 : i32
    %6 = vector.broadcast %c128_i32 : i32 to vector<8x1xi32>
    %7 = arith.addi %5, %6 : vector<8x1xi32>
    %8 = vector.broadcast %7 : vector<8x1xi32> to vector<8x640xi32>
    %9 = arith.cmpi eq, %1, %8 : vector<8x640xi32>
    %10 = arith.ori %4, %9 : vector<8x640xi1>
    %11 = vector.extract_strided_slice %0 {offsets = [0, 2], sizes = [8, 1], strides = [1, 1]} : vector<8x5xi32> to vector<8x1xi32>
    %c256_i32 = arith.constant 256 : i32
    %12 = vector.broadcast %c256_i32 : i32 to vector<8x1xi32>
    %13 = arith.addi %11, %12 : vector<8x1xi32>
    %14 = vector.broadcast %13 : vector<8x1xi32> to vector<8x640xi32>
    %15 = arith.cmpi eq, %1, %14 : vector<8x640xi32>
    %16 = arith.ori %10, %15 : vector<8x640xi1>
    %17 = vector.extract_strided_slice %0 {offsets = [0, 3], sizes = [8, 1], strides = [1, 1]} : vector<8x5xi32> to vector<8x1xi32>
    %c384_i32 = arith.constant 384 : i32
    %18 = vector.broadcast %c384_i32 : i32 to vector<8x1xi32>
    %19 = arith.addi %17, %18 : vector<8x1xi32>
    %20 = vector.broadcast %19 : vector<8x1xi32> to vector<8x640xi32>
    %21 = arith.cmpi eq, %1, %20 : vector<8x640xi32>
    %22 = arith.ori %16, %21 : vector<8x640xi1>
    %23 = vector.extract_strided_slice %0 {offsets = [0, 4], sizes = [8, 1], strides = [1, 1]} : vector<8x5xi32> to vector<8x1xi32>
    %c512_i32 = arith.constant 512 : i32
    %24 = vector.broadcast %c512_i32 : i32 to vector<8x1xi32>
    %25 = arith.addi %23, %24 : vector<8x1xi32>
    %26 = vector.broadcast %25 : vector<8x1xi32> to vector<8x640xi32>
    %27 = arith.cmpi eq, %1, %26 : vector<8x640xi32>
    %28 = arith.ori %22, %27 : vector<8x640xi1>
    %29 = arith.extui %28 : vector<8x640xi1> to vector<8x640xi32>
    %30 = arith.sitofp %29 : vector<8x640xi32> to vector<8x640xf32>
    %c0_1 = arith.constant 0 : index
    %c0_2 = arith.constant 0 : index
    %31 = vector.load %arg2[%c0_1, %c0_2] : memref<640x128xf32, #tpu.memory_space<vmem>>, vector<640x128xf32>
    %cst = arith.constant dense<0.000000e+00> : vector<8x128xf32>
    %32 = tpu.matmul %30, %31, %cst {dimension_numbers = #tpu.dot_dimension_numbers<[1], [0], [0], [1], [0, 0, 1, 1], [], []>} : vector<8x640xf32>, vector<640x128xf32>, vector<8x128xf32> -> vector<8x128xf32>
    %c0_3 = arith.constant 0 : index
    %c0_4 = arith.constant 0 : index
    %33 = vector.load %arg3[%c0_3, %c0_4] : memref<1x128xf32, #tpu.memory_space<vmem>>, vector<1x128xf32>
    %34 = vector.broadcast %33 : vector<1x128xf32> to vector<8x128xf32>
    %35 = arith.addf %32, %34 : vector<8x128xf32>
    %cst_5 = arith.constant 0.000000e+00 : f32
    %36 = vector.broadcast %cst_5 : f32 to vector<8x128xf32>
    %37 = arith.maximumf %35, %36 : vector<8x128xf32>
    %c0_6 = arith.constant 0 : index
    %c0_7 = arith.constant 0 : index
    %38 = vector.load %arg4[%c0_6, %c0_7] : memref<128x128xf32, #tpu.memory_space<vmem>>, vector<128x128xf32>
    %cst_8 = arith.constant dense<0.000000e+00> : vector<8x128xf32>
    %39 = tpu.matmul %37, %38, %cst_8 {dimension_numbers = #tpu.dot_dimension_numbers<[1], [0], [0], [1], [0, 0, 1, 1], [], []>} : vector<8x128xf32>, vector<128x128xf32>, vector<8x128xf32> -> vector<8x128xf32>
    %c0_9 = arith.constant 0 : index
    %c0_10 = arith.constant 0 : index
    %40 = vector.load %arg5[%c0_9, %c0_10] : memref<1x128xf32, #tpu.memory_space<vmem>>, vector<1x128xf32>
    %41 = vector.broadcast %40 : vector<1x128xf32> to vector<8x128xf32>
    %42 = arith.addf %39, %41 : vector<8x128xf32>
    %cst_11 = arith.constant 0.000000e+00 : f32
    %43 = vector.broadcast %cst_11 : f32 to vector<8x128xf32>
    %44 = arith.maximumf %42, %43 : vector<8x128xf32>
    %c0_12 = arith.constant 0 : index
    %c0_13 = arith.constant 0 : index
    %45 = vector.load %arg6[%c0_12, %c0_13] : memref<128x128xf32, #tpu.memory_space<vmem>>, vector<128x128xf32>
    %cst_14 = arith.constant dense<0.000000e+00> : vector<8x128xf32>
    %46 = tpu.matmul %44, %45, %cst_14 {dimension_numbers = #tpu.dot_dimension_numbers<[1], [0], [0], [1], [0, 0, 1, 1], [], []>} : vector<8x128xf32>, vector<128x128xf32>, vector<8x128xf32> -> vector<8x128xf32>
    %c0_15 = arith.constant 0 : index
    %c0_16 = arith.constant 0 : index
    %47 = vector.load %arg7[%c0_15, %c0_16] : memref<1x128xf32, #tpu.memory_space<vmem>>, vector<1x128xf32>
    %48 = vector.broadcast %47 : vector<1x128xf32> to vector<8x128xf32>
    %49 = arith.addf %46, %48 : vector<8x128xf32>
    %50 = tpu.iota {dimensions = array<i32: 1>} : vector<8x128xi32>
    %c8_i32 = arith.constant 8 : i32
    %51 = vector.broadcast %c8_i32 : i32 to vector<8x128xi32>
    %52 = arith.cmpi slt, %50, %51 : vector<8x128xi32>
    %cst_17 = arith.constant 0xFF800000 : f32
    %53 = vector.broadcast %cst_17 : f32 to vector<8x128xf32>
    %54 = arith.select %52, %49, %53 : vector<8x128xi1>, vector<8x128xf32>
    %cst_18 = arith.constant dense<0xFF800000> : vector<8xf32>
    %55 = vector.multi_reduction <maximumf>, %54, %cst_18 [1] : vector<8x128xf32> to vector<8xf32>
    %56 = vector.shape_cast %55 : vector<8xf32> to vector<8x1xf32>
    %57 = vector.broadcast %56 : vector<8x1xf32> to vector<8x128xf32>
    %58 = arith.subf %54, %57 : vector<8x128xf32>
    %59 = math.exp %58 : vector<8x128xf32>
    %cst_19 = arith.constant dense<0.000000e+00> : vector<8xf32>
    %60 = vector.multi_reduction <add>, %59, %cst_19 [1] : vector<8x128xf32> to vector<8xf32>
    %61 = vector.shape_cast %60 : vector<8xf32> to vector<8x1xf32>
    %62 = math.log %61 : vector<8x1xf32>
    %63 = vector.broadcast %62 : vector<8x1xf32> to vector<8x128xf32>
    %64 = arith.subf %58, %63 : vector<8x128xf32>
    %65 = vector.extract_strided_slice %64 {offsets = [0, 0], sizes = [8, 8], strides = [1, 1]} : vector<8x128xf32> to vector<8x8xf32>
    %c0_20 = arith.constant 0 : index
    %c0_21 = arith.constant 0 : index
    %66 = vector.load %arg8[%c0_20, %c0_21] : memref<8x8xf32, #tpu.memory_space<vmem>>, vector<8x8xf32>
    tpu.vector_store %arg8[%c0_20, %c0_21], %65 {strides = array<i32>} : memref<8x8xf32, #tpu.memory_space<vmem>>, vector<8x8xf32>,
    return
  }
  func.func @transform_0(%arg0: i32) -> (i32, i32) {
    %c0_i32 = arith.constant 0 : i32
    %c0_i32_0 = arith.constant 0 : i32
    return %arg0, %c0_i32 : i32, i32
  }
  func.func @transform_1(%arg0: i32) -> (i32, i32) {
    %c0_i32 = arith.constant 0 : i32
    %c0_i32_0 = arith.constant 0 : i32
    %c0_i32_1 = arith.constant 0 : i32
    return %c0_i32, %c0_i32_0 : i32, i32
  }
  func.func @transform_2(%arg0: i32) -> (i32, i32) {
    %c0_i32 = arith.constant 0 : i32
    %c0_i32_0 = arith.constant 0 : i32
    %c0_i32_1 = arith.constant 0 : i32
    return %c0_i32, %c0_i32_0 : i32, i32
  }
  func.func @transform_3(%arg0: i32) -> (i32, i32) {
    %c0_i32 = arith.constant 0 : i32
    %c0_i32_0 = arith.constant 0 : i32
    %c0_i32_1 = arith.constant 0 : i32
    return %c0_i32, %c0_i32_0 : i32, i32
  }
  func.func @transform_4(%arg0: i32) -> (i32, i32) {
    %c0_i32 = arith.constant 0 : i32
    %c0_i32_0 = arith.constant 0 : i32
    %c0_i32_1 = arith.constant 0 : i32
    return %c0_i32, %c0_i32_0 : i32, i32
  }
  func.func @transform_5(%arg0: i32) -> (i32, i32) {
    %c0_i32 = arith.constant 0 : i32
    %c0_i32_0 = arith.constant 0 : i32
    %c0_i32_1 = arith.constant 0 : i32
    return %c0_i32, %c0_i32_0 : i32, i32
  }
  func.func @transform_6(%arg0: i32) -> (i32, i32) {
    %c0_i32 = arith.constant 0 : i32
    %c0_i32_0 = arith.constant 0 : i32
    %c0_i32_1 = arith.constant 0 : i32
    return %c0_i32, %c0_i32_0 : i32, i32
  }
  func.func @transform_7(%arg0: i32) -> (i32, i32) {
    %c0_i32 = arith.constant 0 : i32
    %c0_i32_0 = arith.constant 0 : i32
    return %arg0, %c0_i32 : i32, i32
  }
}

</mosaic_0001>

<bundles_post_ra>
// kernel: tpu_custom_call.1
= control target key start
LH: loop header
LB: loop body
LE: loop exit
PB: predicated region body
PF: predicated region fallthrough
CT: control target
= control target key end

     0   :  { %12 = vsyncpa [#allocation3], 0  ;;  %s739_s0 = inlined_call_operand.hbm [shape: s32[8,5], index: 0, kind: input, shape index: {}]   ;;  %s740_s1 = inlined_call_operand.hbm [shape: f32[640,128], index: 1, kind: input, shape index: {}]   ;;  %s741_s2 = inlined_call_operand.vmem [shape: f32[1,128], index: 2, kind: input, shape index: {}]   ;;  %s742_s3 = inlined_call_operand.hbm [shape: f32[128,128], index: 3, kind: input, shape index: {}]   ;;  %s743_s4 = inlined_call_operand.vmem [shape: f32[1,128], index: 4, kind: input, shape index: {}]   ;;  %s744_s5 = inlined_call_operand.hbm [shape: f32[128,128], index: 5, kind: input, shape index: {}]   ;;  %s745_s6 = inlined_call_operand.vmem [shape: f32[1,128], index: 6, kind: input, shape index: {}]   ;;  %s746_s7 = inlined_call_operand.hbm [shape: f32[8,8], index: 7, kind: output, shape index: {}]  }
   0x1   :  { %13 = vsyncpa [#allocation6], 0 }
   0x2   :  { %14 = vsyncpa [#allocation9], 0  ;;  %s31_s26 = sshll.u32 %s740_s1, 4  ;;  %s32_s26 = int_to_ptr.hbm [resolvable:$true] %s31_s26 }
   0x3   :  { %15 = vsyncpa [#allocation4], 0  ;;  %s627_s27 = smov [#allocation5]   ;;  %s21_s8 = sshll.u32 %s739_s0, 4  ;;  %s22_s8 = int_to_ptr.hbm [resolvable:$true] %s21_s8 }
   0x4   :  { %s33_s28 = sshll.u32 %s627_s27, 4  ;;  %s628_s9 = smov 128   ;;  %s34_s28 = int_to_ptr.vmem [resolvable:$true] %s33_s28 }
   0x5   :  { %s629_s10 = smov 8   ;;  %s630_s11 = smov [#allocation2]  }
   0x6   :  { %39 = dma.hbm_to_vmem [thread:$0]  %s32_s26, 10240, %s34_s28, [#allocation6], %s628_s9, %s628_s9, %s629_s10  }
   0x7   :  { %s23_s12 = sshll.u32 %s630_s11, 4  ;;  %s46_s15 = sshll.u32 %s742_s3, 4  ;;  %s24_s12 = int_to_ptr.vmem [resolvable:$true] %s23_s12  ;;  %s47_s15 = int_to_ptr.hbm [resolvable:$true] %s46_s15 }
   0x8   :  { %26 = dma.hbm_to_vmem [thread:$0]  %s22_s8, 128, %s24_s12, [#allocation3]  }
   0x9   :  { %s61_s17 = sshll.u32 %s744_s5, 4  ;;  %s631_s18 = smov [#allocation7]   ;;  %s62_s17 = int_to_ptr.hbm [resolvable:$true] %s61_s17 }
   0xa   :  { %s48_s19 = sshll.u32 %s631_s18, 4  ;;  %s632_s0 = smov [#allocation8]   ;;  %s49_s19 = int_to_ptr.vmem [resolvable:$true] %s48_s19 }
   0xb   :  { %54 = dma.hbm_to_vmem [thread:$0]  %s47_s15, 2048, %s49_s19, [#allocation6], %s628_s9, %s628_s9, %s629_s10  }
   0xc   :  { %s63_s20 = sshll.u32 %s632_s0, 4  ;;  %s64_s20 = int_to_ptr.vmem [resolvable:$true] %s63_s20 }
   0xd   :  { %69 = dma.hbm_to_vmem [thread:$0]  %s62_s17, 2048, %s64_s20, [#allocation9], %s628_s9, %s628_s9, %s629_s10  }
   0xe   :  { %619 = dma.done.wait [#allocation3], 128  }
   0xf   :  { %620 = vsyncadd [#allocation3], 4294967168 }
  0x10   :  { %621 = dma.done.wait [#allocation6], 12288  }
  0x11   :  { %622 = vsyncadd [#allocation6], 4294955008 }
  0x12   :  { %623 = dma.done.wait [#allocation9], 2048  }
  0x13   :  { %624 = vsyncadd [#allocation9], 4294965248  ;;  %v633_v0 = vmov 0   ;;  %v634_v1 = vmov 2   ;;  %v635_v2 = vmov 4   ;;  %v88_v3 = vld [vmem:[#allocation2] sm:$0xff] }
  0x14   :  { %486 = vset.pattern.permute.xlu0 %v633_v0  ;;  %488 = vset.pattern.permute.xlu1 %v634_v1  ;;  %v184_v4 = vld [vmem:[#allocation5 + $0x78] sm:$0xff]  ;;  %v117_v5 = vadd.s32 256, %v88_v3  ;;  %v145_v6 = vadd.s32 512, %v88_v3  ;;  %v183_v7 = vld [vmem:[#allocation5 + $0x70] sm:$0xff]  ;;  %v182_v8 = vld [vmem:[#allocation5 + $0x68] sm:$0xff]  ;;  %v103_v13 = vadd.s32 128, %v88_v3 }
  0x15   :  { %490 = vset.pattern.permute.xlu2 %v635_v2  ;;  %96 = vperm.xlu0 %486, %v88_v3   ;;  %v200_v9 = vld [vmem:[#allocation5 + $0xf8] sm:$0xff]  ;;  %v181_v10 = vld [vmem:[#allocation5 + $0x60] sm:$0xff]  ;;  %v199_v14 = vld [vmem:[#allocation5 + $0xf0] sm:$0xff]  ;;  %v131_v18 = vadd.s32 384, %v88_v3  ;;  %v636_v20 = vmov 1   ;;  %v637_v24 = vmov 3  }
  0x16   :  { %253 = vmatpush.msra.mxu0 %v184_v4  ;;  %119 = vperm.xlu1 %488, %v117_v5   ;;  %v216_v11 = vld [vmem:[#allocation5 + $0x178] sm:$0xff]  ;;  %v215_v15 = vld [vmem:[#allocation5 + $0x170] sm:$0xff]  ;;  %v198_v19 = vld [vmem:[#allocation5 + $0xe8] sm:$0xff] }
  0x17   :  { %147 = vperm.xlu2 %490, %v145_v6   ;;  %273 = vmatpush.msra.mxu1 %v200_v9  ;;  %v232_v12 = vld [vmem:[#allocation5 + $0x1f8] sm:$0xff]  ;;  %v231_v16 = vld [vmem:[#allocation5 + $0x1f0] sm:$0xff]  ;;  %v214_v22 = vld [vmem:[#allocation5 + $0x168] sm:$0xff] }
  0x18   :  { %254 = vmatpush.msra.mxu0 %v183_v7  ;;  %293 = vmatpush.msra.mxu2 %v216_v11  ;;  %v180_v17 = vld [vmem:[#allocation5 + $0x58] sm:$0xff]  ;;  %v179_v21 = vld [vmem:[#allocation5 + $0x50] sm:$0xff]  ;;  %v230_v23 = vld [vmem:[#allocation5 + $0x1e8] sm:$0xff] }
  0x19   :  { %313 = vmatpush.msra.mxu3 %v232_v12  ;;  %274 = vmatpush.msra.mxu1 %v199_v14  ;;  %v178_v25 = vld [vmem:[#allocation5 + $0x48] sm:$0xff]  ;;  %v197_v26 = vld [vmem:[#allocation5 + $0xe0] sm:$0xff]  ;;  %v196_v30 = vld [vmem:[#allocation5 + $0xd8] sm:$0xff] }
  0x1a   :  { %255 = vmatpush.msra.mxu0 %v182_v8  ;;  %294 = vmatpush.msra.mxu2 %v215_v15  ;;  %v213_v27 = vld [vmem:[#allocation5 + $0x160] sm:$0xff]  ;;  %v176_v31 = vld [vmem:[#allocation5 + $0x38] sm:$0xff]  ;;  %v195_v34 = vld [vmem:[#allocation5 + $0xd0] sm:$0xff] }
  0x1b   :  { %314 = vmatpush.msra.mxu3 %v231_v16  ;;  %275 = vmatpush.msra.mxu1 %v198_v19  ;;  %v229_v28 = vld [vmem:[#allocation5 + $0x1e0] sm:$0xff]  ;;  %v212_v32 = vld [vmem:[#allocation5 + $0x158] sm:$0xff]  ;;  %v211_v35 = vld [vmem:[#allocation5 + $0x150] sm:$0xff] }
  0x1c   :  { %256 = vmatpush.msra.mxu0 %v181_v10  ;;  %v177_v29 = vld [vmem:[#allocation5 + $0x40] sm:$0xff]  ;;  %295 = vmatpush.msra.mxu2 %v214_v22  ;;  %v228_v33 = vld [vmem:[#allocation5 + $0x1d8] sm:$0xff]  ;;  %v227_v36 = vld [vmem:[#allocation5 + $0x1d0] sm:$0xff] }
  0x1d   :  { %487 = vset.pattern.permute.xlu0 %v636_v20  ;;  %315 = vmatpush.msra.mxu3 %v230_v23  ;;  %v175_v37 = vld [vmem:[#allocation5 + $0x30] sm:$0xff]  ;;  %v194_v38 = vld [vmem:[#allocation5 + $0xc8] sm:$0xff]  ;;  %v193_v42 = vld [vmem:[#allocation5 + $0xc0] sm:$0xff] }
  0x1e   :  { %105 = vperm.xlu0 %487, %v103_v13   ;;  %257 = vmatpush.msra.mxu0 %v180_v17  ;;  %v210_v39 = vld [vmem:[#allocation5 + $0x148] sm:$0xff]  ;;  %v209_v43 = vld [vmem:[#allocation5 + $0x140] sm:$0xff]  ;;  %v172_v46 = vld [vmem:[#allocation5 + $0x18] sm:$0xff] }
  0x1f   :  { %489 = vset.pattern.permute.xlu1 %v637_v24  ;;  %276 = vmatpush.msra.mxu1 %v197_v26  ;;  %v226_v40 = vld [vmem:[#allocation5 + $0x1c8] sm:$0xff]  ;;  %v225_v44 = vld [vmem:[#allocation5 + $0x1c0] sm:$0xff]  ;;  %v171_v47 = vld [vmem:[#allocation5 + $0x10] sm:$0xff] }
  0x20   :  { %133 = vperm.xlu1 %489, %v131_v18   ;;  %258 = vmatpush.msra.mxu0 %v179_v21  ;;  %v174_v41 = vld [vmem:[#allocation5 + $0x28] sm:$0xff]  ;;  %v173_v45 = vld [vmem:[#allocation5 + $0x20] sm:$0xff]  ;;  %v248_v50 = vld [vmem:[#allocation5 + $0x278] sm:$0xff] }
  0x21   :  { %296 = vmatpush.msra.mxu2 %v213_v27  ;;  %316 = vmatpush.msra.mxu3 %v229_v28  ;;  %v170_v48 = vld [vmem:[#allocation5 + $0x8] sm:$0xff]  ;;  %v169_v49 = vld [vmem:[#allocation5] sm:$0xff]  ;;  %v247_v51 = vld [vmem:[#allocation5 + $0x270] sm:$0xff] }
  0x22   :  { %259 = vmatpush.msra.mxu0 %v178_v25  ;;  %277 = vmatpush.msra.mxu1 %v196_v30  ;;  %v246_v52 = vld [vmem:[#allocation5 + $0x268] sm:$0xff]  ;;  %v245_v53 = vld [vmem:[#allocation5 + $0x260] sm:$0xff]  ;;  %v192_v54 = vld [vmem:[#allocation5 + $0xb8] sm:$0xff]  ;;  %v89_v30 = vlaneseq }
  0x23   :  { %297 = vmatpush.msra.mxu2 %v212_v32  ;;  %317 = vmatpush.msra.mxu3 %v228_v33  ;;  %v208_v55 = vld [vmem:[#allocation5 + $0x138] sm:$0xff]  ;;  %v191_v58 = vld [vmem:[#allocation5 + $0xb0] sm:$0xff]  ;;  %v190_v62 = vld [vmem:[#allocation5 + $0xa8] sm:$0xff] }
  0x24   :  { %260 = vmatpush.msra.mxu0 %v177_v29  ;;  %278 = vmatpush.msra.mxu1 %v195_v34  ;;  %v224_v56 = vld [vmem:[#allocation5 + $0x1b8] sm:$0xff]  ;;  %v207_v59 = vld [vmem:[#allocation5 + $0x130] sm:$0xff]  ;;  %v206_v63 = vld [vmem:[#allocation5 + $0x128] sm:$0xff]  ;;  %v698_v33 = vand.u32 127, %v89_v30 }
  0x25   :  { %298 = vmatpush.msra.mxu2 %v211_v35  ;;  %318 = vmatpush.msra.mxu3 %v227_v36  ;;  %v244_v57 = vld [vmem:[#allocation5 + $0x258] sm:$0xff]  ;;  %v223_v60 = vld [vmem:[#allocation5 + $0x1b0] sm:$0xff]  ;;  %v222_v0 = vld [vmem:[#allocation5 + $0x1a8] sm:$0xff] }
  0x26   :  { %261 = vmatpush.msra.mxu0 %v176_v31  ;;  %279 = vmatpush.msra.mxu1 %v194_v38  ;;  %v243_v61 = vld [vmem:[#allocation5 + $0x250] sm:$0xff]  ;;  %v242_v1 = vld [vmem:[#allocation5 + $0x248] sm:$0xff]  ;;  %v205_v3 = vld [vmem:[#allocation5 + $0x120] sm:$0xff]  ;;  %v91_v38 = vadd.s32 128, %v698_v33 }
  0x27   :  { %299 = vmatpush.msra.mxu2 %v210_v39  ;;  %319 = vmatpush.msra.mxu3 %v226_v40  ;;  %v221_v4 = vld [vmem:[#allocation5 + $0x1a0] sm:$0xff]  ;;  %v188_v6 = vld [vmem:[#allocation5 + $0x98] sm:$0xff]  ;;  %v187_v10 = vld [vmem:[#allocation5 + $0x90] sm:$0xff] }
  0x28   :  { %262 = vmatpush.msra.mxu0 %v175_v37  ;;  %280 = vmatpush.msra.mxu1 %v193_v42  ;;  %v241_v5 = vld [vmem:[#allocation5 + $0x240] sm:$0xff]  ;;  %v204_v7 = vld [vmem:[#allocation5 + $0x118] sm:$0xff]  ;;  %v203_v11 = vld [vmem:[#allocation5 + $0x110] sm:$0xff]  ;;  %v92_v42 = vadd.s32 256, %v698_v33 }
  0x29   :  { %300 = vmatpush.msra.mxu2 %v209_v43  ;;  %320 = vmatpush.msra.mxu3 %v225_v44  ;;  %v220_v8 = vld [vmem:[#allocation5 + $0x198] sm:$0xff]  ;;  %v219_v12 = vld [vmem:[#allocation5 + $0x190] sm:$0xff]  ;;  %v186_v14 = vld [vmem:[#allocation5 + $0x88] sm:$0xff]  ;;  %v638_v43 = vmov 0.0  }
  0x2a   :  { %263 = vmatpush.msra.mxu0 %v174_v41  ;;  %491 = vset.pattern.permute.xlu0 %v635_v2  ;;  %v189_v2 = vld [vmem:[#allocation5 + $0xa0] sm:$0xff]  ;;  %v240_v9 = vld [vmem:[#allocation5 + $0x238] sm:$0xff]  ;;  %v239_v13 = vld [vmem:[#allocation5 + $0x230] sm:$0xff] }
  0x2b   :  { %281 = vmatpush.msra.mxu1 %v192_v54  ;;  %301 = vmatpush.msra.mxu2 %v208_v55  ;;  %v202_v15 = vld [vmem:[#allocation5 + $0x108] sm:$0xff]  ;;  %v185_v18 = vld [vmem:[#allocation5 + $0x80] sm:$0xff]  ;;  %v236_v22 = vld [vmem:[#allocation5 + $0x218] sm:$0xff] }
  0x2c   :  { %264 = vmatpush.msra.mxu0 %v173_v45  ;;  %321 = vmatpush.msra.mxu3 %v224_v56  ;;  %v218_v16 = vld [vmem:[#allocation5 + $0x188] sm:$0xff]  ;;  %v201_v19 = vld [vmem:[#allocation5 + $0x100] sm:$0xff]  ;;  %v235_v23 = vld [vmem:[#allocation5 + $0x210] sm:$0xff]  ;;  %v93_v45 = vadd.s32 384, %v698_v33 }
  0x2d   :  { %282 = vmatpush.msra.mxu1 %v191_v58  ;;  %302 = vmatpush.msra.mxu2 %v207_v59  ;;  %v238_v17 = vld [vmem:[#allocation5 + $0x228] sm:$0xff]  ;;  %v217_v20 = vld [vmem:[#allocation5 + $0x180] sm:$0xff]  ;;  %v369_v27 = vld [vmem:[#allocation7 + $0x78] sm:$0xff] }
  0x2e   :  { %265 = vmatpush.msra.mxu0 %v172_v46  ;;  %322 = vmatpush.msra.mxu3 %v223_v60  ;;  %v237_v21 = vld [vmem:[#allocation5 + $0x220] sm:$0xff]  ;;  %v234_v24 = vld [vmem:[#allocation5 + $0x208] sm:$0xff]  ;;  %v368_v28 = vld [vmem:[#allocation7 + $0x70] sm:$0xff] }
  0x2f   :  { %283 = vmatpush.msra.mxu1 %v190_v62  ;;  %303 = vmatpush.msra.mxu2 %v206_v63  ;;  %v233_v26 = vld [vmem:[#allocation5 + $0x200] sm:$0xff]  ;;  %v367_v31 = vld [vmem:[#allocation7 + $0x68] sm:$0xff]  ;;  %v365_v34 = vld [vmem:[#allocation7 + $0x58] sm:$0xff] }
  0x30   :  { %266 = vmatpush.msra.mxu0 %v171_v47  ;;  %323 = vmatpush.msra.mxu3 %v222_v0  ;;  %v366_v32 = vld [vmem:[#allocation7 + $0x60] sm:$0xff]  ;;  %v364_v37 = vld [vmem:[#allocation7 + $0x50] sm:$0xff]  ;;  %v363_v40 = vld [vmem:[#allocation7 + $0x48] sm:$0xff]  ;;  %v94_v47 = vadd.s32 512, %v698_v33 }
  0x31   :  { %284 = vmatpush.msra.mxu1 %v189_v2  ;;  %304 = vmatpush.msra.mxu2 %v205_v3  ;;  %v362_v41 = vld [vmem:[#allocation7 + $0x40] sm:$0xff]  ;;  %v357_v55 = vld [vmem:[#allocation7 + $0x18] sm:$0xff]  ;;  %v356_v56 = vld [vmem:[#allocation7 + $0x10] sm:$0xff] }
  0x32   :  { %267 = vmatpush.msra.mxu0 %v170_v48  ;;  %324 = vmatpush.msra.mxu3 %v221_v4  ;;  %v358_v54 = vld [vmem:[#allocation7 + $0x20] sm:$0xff]  ;;  %v410_v58 = vld [vmem:[#allocation8 + $0x78] sm:$0xff]  ;;  %v409_v59 = vld [vmem:[#allocation8 + $0x70] sm:$0xff] }
  0x33   :  { %285 = vmatpush.msra.mxu1 %v188_v6  ;;  %305 = vmatpush.msra.mxu2 %v204_v7  ;;  %v354_v60 = vld [vmem:[#allocation7] sm:$0xff]  ;;  %v406_v63 = vld [vmem:[#allocation8 + $0x58] sm:$0xff]  ;;  %v405_v0 = vld [vmem:[#allocation8 + $0x50] sm:$0xff] }
  0x34   :  { %268 = vmatpush.msra.mxu0 %v169_v49  ;;  %325 = vmatpush.msra.mxu3 %v220_v8  ;;  %v407_v62 = vld [vmem:[#allocation8 + $0x60] sm:$0xff]  ;;  %v492_v2 = vld [vmem:[%s741_s2] ss:$0 sm:$0xff]  ;;  %v401_v7 = vld [vmem:[#allocation8 + $0x30] sm:$0xff] }
  0x35   :  { %286 = vmatpush.msra.mxu1 %v187_v10  ;;  %306 = vmatpush.msra.mxu2 %v203_v11  ;;  %v403_v3 = vld [vmem:[#allocation8 + $0x40] sm:$0xff]  ;;  %v400_v8 = vld [vmem:[#allocation8 + $0x28] sm:$0xff] }
  0x36   :  { %333 = vmatpush.msrb.mxu0 %v248_v50  ;;  %326 = vmatpush.msra.mxu3 %v219_v12  ;;  %v399_v11 = vld [vmem:[#allocation8 + $0x20] sm:$0xff] }
  0x37   :  { %287 = vmatpush.msra.mxu1 %v186_v14  ;;  %307 = vmatpush.msra.mxu2 %v202_v15  ;;  %v398_v14 = vld [vmem:[#allocation8 + $0x18] sm:$0xff] }
  0x38   :  { %334 = vmatpush.msrb.mxu0 %v247_v51  ;;  %327 = vmatpush.msra.mxu3 %v218_v16  ;;  %v361_v51 = vld [vmem:[#allocation7 + $0x38] sm:$0xff] }
  0x39   :  { %288 = vmatpush.msra.mxu1 %v185_v18  ;;  %308 = vmatpush.msra.mxu2 %v201_v19 }
  0x3a   :  { %335 = vmatpush.msrb.mxu0 %v246_v52  ;;  %328 = vmatpush.msra.mxu3 %v217_v20  ;;  %v360_v52 = vld [vmem:[#allocation7 + $0x30] sm:$0xff] }
  0x3b   :  { %374 = vmatpush.msrb.mxu1 %v369_v27  ;;  %415 = vmatpush.msrb.mxu2 %v410_v58  ;;  %v397_v20 = vld [vmem:[#allocation8 + $0x10] sm:$0xff]  ;;  %v494_v27 = vld [vmem:[%s745_s6] ss:$0 sm:$0xff]  ;;  %s456_s6 = sshll.u32 %s746_s7, 4  ;;  %s457_s6 = int_to_ptr.hbm [resolvable:$true] %s456_s6 }
  0x3c   :  { %336 = vmatpush.msrb.mxu0 %v245_v53  ;;  %v359_v53 = vld [vmem:[#allocation7 + $0x28] sm:$0xff] }
  0x3d   :  { %375 = vmatpush.msrb.mxu1 %v368_v28  ;;  %416 = vmatpush.msrb.mxu2 %v409_v59 }
  0x3e   :  { %337 = vmatpush.msrb.mxu0 %v244_v57  ;;  %v355_v57 = vld [vmem:[#allocation7 + $0x8] sm:$0xff] }
  0x3f   :  { %376 = vmatpush.msrb.mxu1 %v367_v31 }
  0x40   :  { %338 = vmatpush.msrb.mxu0 %v243_v61  ;;  %v408_v61 = vld [vmem:[#allocation8 + $0x68] sm:$0xff] }
  0x41   :  { %377 = vmatpush.msrb.mxu1 %v366_v32  ;;  %417 = vmatpush.msrb.mxu2 %v408_v61 }
  0x42   :  { %339 = vmatpush.msrb.mxu0 %v242_v1  ;;  %v404_v1 = vld [vmem:[#allocation8 + $0x48] sm:$0xff] }
  0x43   :  { %378 = vmatpush.msrb.mxu1 %v365_v34  ;;  %418 = vmatpush.msrb.mxu2 %v407_v62 }
  0x44   :  { %340 = vmatpush.msrb.mxu0 %v241_v5  ;;  %v402_v5 = vld [vmem:[#allocation8 + $0x38] sm:$0xff] }
  0x45   :  { %379 = vmatpush.msrb.mxu1 %v364_v37  ;;  %419 = vmatpush.msrb.mxu2 %v406_v63 }
  0x46   :  { %341 = vmatpush.msrb.mxu0 %v240_v9 }
  0x47   :  { %380 = vmatpush.msrb.mxu1 %v363_v40  ;;  %420 = vmatpush.msrb.mxu2 %v405_v0 }
  0x48   :  { %342 = vmatpush.msrb.mxu0 %v239_v13 }
  0x49   :  { %381 = vmatpush.msrb.mxu1 %v362_v41  ;;  %421 = vmatpush.msrb.mxu2 %v404_v1 }
  0x4a   :  { %343 = vmatpush.msrb.mxu0 %v238_v17 }
  0x4b   :  { %382 = vmatpush.msrb.mxu1 %v361_v51  ;;  %422 = vmatpush.msrb.mxu2 %v403_v3 }
  0x4c   :  { %344 = vmatpush.msrb.mxu0 %v237_v21  ;;  %v396_v21 = vld [vmem:[#allocation8 + $0x8] sm:$0xff] }
  0x4d   :  { %383 = vmatpush.msrb.mxu1 %v360_v52  ;;  %423 = vmatpush.msrb.mxu2 %v402_v5 }
  0x4e   :  { %345 = vmatpush.msrb.mxu0 %v236_v22  ;;  %v395_v22 = vld [vmem:[#allocation8] sm:$0xff] }
  0x4f   :  { %384 = vmatpush.msrb.mxu1 %v359_v53  ;;  %424 = vmatpush.msrb.mxu2 %v401_v7 }
  0x50   :  { %346 = vmatpush.msrb.mxu0 %v235_v23  ;;  %v493_v23 = vld [vmem:[%s743_s4] ss:$0 sm:$0xff]  ;;  %s639_s4 = smov [#allocation10]  }
  0x51   :  { %385 = vmatpush.msrb.mxu1 %v358_v54  ;;  %425 = vmatpush.msrb.mxu2 %v400_v8  ;;  %s454_s24 = sshll.u32 %s639_s4, 4  ;;  %s455_s24 = int_to_ptr.vmem [resolvable:$true] %s454_s24 }
  0x52   :  { %347 = vmatpush.msrb.mxu0 %v234_v24 }
  0x53   :  { %386 = vmatpush.msrb.mxu1 %v357_v55  ;;  %426 = vmatpush.msrb.mxu2 %v399_v11 }
  0x54   :  { %348 = vmatpush.msrb.mxu0 %v233_v26 }
  0x55   :  { %387 = vmatpush.msrb.mxu1 %v356_v56  ;;  %427 = vmatpush.msrb.mxu2 %v398_v14 }
  0x57   :  { %388 = vmatpush.msrb.mxu1 %v355_v57  ;;  %428 = vmatpush.msrb.mxu2 %v397_v20 }
  0x59   :  { %389 = vmatpush.msrb.mxu1 %v354_v60  ;;  %429 = vmatpush.msrb.mxu2 %v396_v21 }
  0x5b   :  { %430 = vmatpush.msrb.mxu2 %v395_v22 }
  0x71   :  { %v700_v35 = vpop.permute.xlu2 %147 }
  0x72   :  { %vm149_vm4 = vcmp.eq.s32.totalorder %v698_v33, %v700_v35  ;;  %vm150_vm14 = vcmp.eq.s32.totalorder %v91_v38, %v700_v35 }
  0x87   :  { %v694_v25 = vpop.permute.xlu0 %96 }
  0x88   :  { %v696_v29 = vpop.permute.xlu1 %119  ;;  %vm98_vm0 = vcmp.eq.s32.totalorder %v698_v33, %v694_v25  ;;  %vm99_vm10 = vcmp.eq.s32.totalorder %v91_v38, %v694_v25 }
  0x89   :  { %vm121_vm3 = vcmp.eq.s32.totalorder %v698_v33, %v696_v29  ;;  %vm122_vm13 = vcmp.eq.s32.totalorder %v91_v38, %v696_v29 }
  0x90   :  { %v106_v36 = vpop.permute.xlu0 %105 }
  0x91   :  { %vm107_vm1 = vcmp.eq.s32.totalorder %v698_v33, %v106_v36  ;;  %vm108_vm7 = vcmp.eq.s32.totalorder %v91_v38, %v106_v36 }
  0x92   :  { %v134_v39 = vpop.permute.xlu1 %133  ;;  %vm112_vm2 = vmor %vm98_vm0, %vm107_vm1  ;;  %vm109_vm0 = vcmp.eq.s32.totalorder %v92_v42, %v106_v36 }
  0x93   :  { %vm126_vm5 = vmor %vm112_vm2, %vm121_vm3  ;;  %vm135_vm6 = vcmp.eq.s32.totalorder %v698_v33, %v134_v39  ;;  %vm136_vm11 = vcmp.eq.s32.totalorder %v91_v38, %v134_v39  ;;  %vm100_vm3 = vcmp.eq.s32.totalorder %v92_v42, %v694_v25 }
  0x94   :  { %vm140_vm8 = vmor %vm126_vm5, %vm135_vm6  ;;  %vm123_vm6 = vcmp.eq.s32.totalorder %v92_v42, %v696_v29 }
  0x95   :  { %vm154_vm9 = vmor %vm140_vm8, %vm149_vm4  ;;  %vm137_vm4 = vcmp.eq.s32.totalorder %v92_v42, %v134_v39 }
  0x96   :  { %v468_v44 = vsel %vm154_vm9, 1.0, %v638_v43  ;;  %vm113_vm12 = vmor %vm99_vm10, %vm108_vm7  ;;  %vm151_vm7 = vcmp.eq.s32.totalorder %v92_v42, %v700_v35  ;;  %vm110_vm9 = vcmp.eq.s32.totalorder %v93_v45, %v106_v36 }
  0x97   :  { %269 = vmatmul.f32.vlgmr.msra.gmra.mxu0 %v468_v44  ;;  %vm127_vm15 = vmor %vm113_vm12, %vm122_vm13  ;;  %vm138_vm13 = vcmp.eq.s32.totalorder %v93_v45, %v134_v39 }
  0x98   :  { %vm141_vm1 = vmor %vm127_vm15, %vm136_vm11  ;;  %vm101_vm11 = vcmp.eq.s32.totalorder %v93_v45, %v694_v25  ;;  %vm124_vm15 = vcmp.eq.s32.totalorder %v93_v45, %v696_v29 }
  0x99   :  { %vm155_vm2 = vmor %vm141_vm1, %vm150_vm14  ;;  %vm111_vm1 = vcmp.eq.s32.totalorder %v94_v47, %v106_v36 }
  0x9a   :  { %v469_v46 = vsel %vm155_vm2, 1.0, %v638_v43  ;;  %vm114_vm5 = vmor %vm100_vm3, %vm109_vm0  ;;  %vm152_vm0 = vcmp.eq.s32.totalorder %v93_v45, %v700_v35 }
  0x9b   :  { %289 = vmatmul.f32.vlgmr.msra.gmra.mxu1 %v469_v46  ;;  %vm128_vm8 = vmor %vm114_vm5, %vm123_vm6  ;;  %vm102_vm6 = vcmp.eq.s32.totalorder %v94_v47, %v694_v25 }
  0x9c   :  { %vm142_vm10 = vmor %vm128_vm8, %vm137_vm4  ;;  %vm139_vm4 = vcmp.eq.s32.totalorder %v94_v47, %v134_v39 }
  0x9d   :  { %vm156_vm12 = vmor %vm142_vm10, %vm151_vm7  ;;  %vm125_vm7 = vcmp.eq.s32.totalorder %v94_v47, %v696_v29  ;;  %vm153_vm10 = vcmp.eq.s32.totalorder %v94_v47, %v700_v35 }
  0x9e   :  { %v470_v48 = vsel %vm156_vm12, 1.0, %v638_v43  ;;  %vm115_vm14 = vmor %vm101_vm11, %vm110_vm9 }
  0x9f   :  { %309 = vmatmul.f32.vlgmr.msra.gmra.mxu2 %v470_v48  ;;  %vm129_vm2 = vmor %vm115_vm14, %vm124_vm15  ;;  %vm447_vm14 = vcmask 64512  }
  0xa0   :  { %vm143_vm3 = vmor %vm129_vm2, %vm138_vm13  ;;  %vm435_vm13 = vcmp.lt.s32.totalorder %v698_v33, 8 }
  0xa1   :  { %vm157_vm5 = vmor %vm143_vm3, %vm152_vm0 }
  0xa2   :  { %v471_v49 = vsel %vm157_vm5, 1.0, %v638_v43  ;;  %vm116_vm8 = vmor %vm102_vm6, %vm111_vm1 }
  0xa3   :  { %329 = vmatmul.f32.vlgmr.msra.gmra.mxu3 %v471_v49  ;;  %vm130_vm9 = vmor %vm116_vm8, %vm125_vm7 }
  0xa4   :  { %vm144_vm12 = vmor %vm130_vm9, %vm139_vm4 }
  0xa5   :  { %vm158_vm11 = vmor %vm144_vm12, %vm153_vm10 }
  0xa6   :  { %v472_v50 = vsel %vm158_vm11, 1.0, %v638_v43 }
  0xa7   :  { %349 = vmatmul.f32.vlgmr.msrb.gmra.mxu0 %v472_v50 }
 0x114   :  { %v270_v4 = vpop.f32.mrf.mxu0 }
 0x115   :  { %v271_v6 = vadd.f32 %v492_v2, %v270_v4 }
 0x118   :  { %v290_v9 = vpop.f32.mrf.mxu1 }
 0x119   :  { %v291_v10 = vadd.f32 %v290_v9, %v271_v6 }
 0x122   :  { %v310_v12 = vpop.f32.mrf.mxu2 }
 0x123   :  { %v311_v13 = vadd.f32 %v310_v12, %v291_v10 }
 0x124   :  { %v350_v17 = vpop.f32.mrf.mxu0 }
 0x126   :  { %v330_v15 = vpop.f32.mrf.mxu3 }
 0x127   :  { %v331_v16 = vadd.f32 %v330_v15, %v311_v13 }
 0x129   :  { %v351_v18 = vadd.f32 %v350_v17, %v331_v16 }
 0x12b   :  { %v353_v19 = vmax.f32 %v351_v18, 0.0 }
 0x12d   :  { %390 = vmatmul.f32.vlgmr.msrb.gmra.mxu1 %v353_v19 }
 0x1aa   :  { %v391_v24 = vpop.f32.mrf.mxu1 }
 0x1ab   :  { %v392_v25 = vadd.f32 %v493_v23, %v391_v24 }
 0x1ad   :  { %v394_v26 = vmax.f32 %v392_v25, 0.0 }
 0x1af   :  { %431 = vmatmul.f32.vlgmr.msrb.gmra.mxu2 %v394_v26 }
 0x232   :  { %v432_v28 = vpop.f32.mrf.mxu2 }
 0x233   :  { %v433_v29 = vadd.f32 %v494_v27, %v432_v28 }
 0x235   :  { %v436_v30 = vsel %vm435_vm13, %v433_v29, -inf }
 0x236   :  { %437 = vmax.xlane.f32.xlu2 %v436_v30 }
 0x2a9   :  { %v438_v31 = vpop.xlane.xlu2 %437 }
 0x2aa   :  { %v439_v32 = vsub.f32 %v436_v30, %v438_v31 }
 0x2ac   :  { %v440_v34 = vmul.f32 1.442695, %v439_v32 }
 0x2ae   :  { %495 = vpow2.f32 %v440_v34 }
 0x2b4   :  { %v496_v35 = vpop.eup %495 }
 0x2b5   :  { %442 = vadd.xlane.f32.xlu1 %v496_v35 }
 0x328   :  { %v443_v36 = vpop.xlane.xlu1 %442 }
 0x329   :  { %497 = vlog2.f32 %v443_v36 }
 0x32f   :  { %v498_v37 = vpop.eup %497 }
 0x330   :  { %v445_v38 = vmul.f32 0.6931472, %v498_v37 }
 0x332   :  { %v446_v33 = vsub.f32 %v439_v32, %v445_v38 }
 0x334   :  { %448 = vst.msk [vmem:[#allocation10] sm:$0xff] %vm447_vm14, %v446_v33 }
 0x335   :  { %459 = dma.vmem_to_hbm [thread:$0]  %s455_s24, 128, %s457_s6, [#allocation4]  }
 0x336   :  { %625 = dma.done.wait [#allocation4], 128  }
 0x337   :  { %626 = vsyncadd [#allocation4], 4294967168 }
 0x338   :  { %464 = vsyncpa [#allocation3], 1 }
 0x339   :  { %465 = vsyncpa [#allocation6], 1 }
 0x33a   :  { %466 = vsyncpa [#allocation9], 1 }
 0x33b   :  { %467 = vsyncpa [#allocation4], 1 }

</bundles_post_ra>
